<compile_context>
chip_gen: v7x
topology: tpu7x:2x2x1
jax: 0.10.0
libtpu: 0.0.40
codegen_flags: <defaults>
</compile_context>

<pallas_src>
import functools
import math

import jax
import jax.numpy as jnp
from jax.experimental import pallas as pl
from jax.experimental.pallas import tpu as pltpu


def _conv_bn_lrelu_kernel(x_ref, w_ref, m_ref, shift_ref, o_ref, xcat_ref,
                          *, KH, KW, Wp, Cin_pad, slope):
    # x_ref:     (1, 1, Cin_pad, WINL)  bf16 flat row-tile window (incl. halo)
    # w_ref:     (Cout, KH*KW*Cin_pad)  bf16 weights, BN scale folded in
    # m_ref:     (KW, TW)               bf16 per-kw width-halo validity masks
    # shift_ref: (Cout, 1)              f32 folded BN shift (incl. conv bias)
    # o_ref:     (1, Cout, TW)          bf16 lane-dense output tile (TW % 128 == 0)
    # xcat_ref:  (KH*KW*Cin_pad, TW)    bf16 scratch: stacked pre-masked taps
    TW = o_ref.shape[2]

    x = x_ref[0, 0]                     # (Cin_pad, WINL), resident for all taps
    masks = m_ref[...]                  # (KW, TW)

    # Build one deep MXU operand: per (kw, kh) tap take the statically
    # lane-shifted slice of the flat window, cancel width wraparound with the
    # bf16 per-kw mask (VPU), and stack it on the sublane axis (8-aligned).
    for kw in range(KW):
        mk = masks[kw:kw + 1, :]                            # (1, TW) bf16
        for kh in range(KH):
            s = kh * Wp + kw                                # static lane shift
            r = (kw * KH + kh) * Cin_pad                    # static sublane offset
            xcat_ref[r:r + Cin_pad, :] = x[:, s:s + TW] * mk

    # Whole conv = one dot of depth KH*KW*Cin_pad, f32 accumulation on the MXU.
    acc = jnp.dot(w_ref[...], xcat_ref[...],
                  preferred_element_type=jnp.float32)       # (Cout, TW)

    # Epilogue: BN scale already folded into w; add shift, LeakyReLU, bf16 store.
    y = acc + shift_ref[...]
    y = jnp.where(y >= 0, y, slope * y)
    o_ref[0] = y.astype(o_ref.dtype)


def _pick_row_tile(H, Wp, N, Cin_pad, Cout, KH, KW, out_bytes,
                   budget_bytes=20 * 1024 * 1024):
    """Largest TH (divisor of H with TH*Wp % 128 == 0) whose VMEM footprint fits
    the budget; prefers >= 2 total grid steps (megacore / v7x dual TC)."""
    def footprint(TH):
        TW = TH * Wp
        WINL = (TH + KH - 1) * Wp + KW - 1
        K = KH * KW * Cin_pad
        return (2 * Cin_pad * WINL * 2          # x window, double-buffered, bf16
                + 2 * Cout * TW * out_bytes     # output tile, double-buffered
                + 2 * Cout * K * 2              # weights, double-buffered
                + 2 * KW * TW * 2               # masks
                + K * TW * 2                    # xcat scratch
                + 2 * Cout * TW * 4)            # f32 acc / epilogue temporaries

    cands = [TH for TH in range(H, 0, -1)
             if H % TH == 0 and (TH * Wp) % 128 == 0]       # TH=H always valid
    fitting = [TH for TH in cands if footprint(TH) <= budget_bytes]
    pool = fitting if fitting else cands[-1:]               # smallest valid tile
    multi = [TH for TH in pool if N * (H // TH) >= 2]       # keep both TCs busy
    return (multi or pool)[0]


def conv_dropout_norm_relu(x_nchw, w_oihw, conv_bias, gamma, beta,
                           running_mean, running_var,
                           *, eps=1e-5, negative_slope=0.01,
                           out_dtype=jnp.bfloat16):
    """Forward pass of ConvDropoutNormReLU (dropout = Identity, BN eval mode)."""
    N, Cin, H, W = x_nchw.shape
    Cout, Cin_w, KH, KW = w_oihw.shape
    assert Cin == Cin_w
    assert KH % 2 == 1 and KW % 2 == 1, "odd kernel sizes only"
    ph, pw = (KH - 1) // 2, (KW - 1) // 2

    # Pad Cin to a sublane multiple so every tap slab lands 8-aligned in scratch.
    Cin_pad = ((Cin + 7) // 8) * 8
    # Pad W so whole-image tiles are lane-dense (H*Wp % 128 == 0); garbage
    # output columns [W, Wp) are cropped after the kernel.
    g = 128 // math.gcd(H, 128)
    Wp = ((W + g - 1) // g) * g

    out_bytes = jnp.dtype(out_dtype).itemsize
    TH = _pick_row_tile(H, Wp, N, Cin_pad, Cout, KH, KW, out_bytes)
    n_tiles = H // TH
    TW = TH * Wp
    WINL = (TH + KH - 1) * Wp + KW - 1          # flat window length incl. halo

    # --- wrapper glue (no transposes) --------------------------------------
    # bf16 input; zero-pad channels -> Cin_pad, height halo ph, width -> Wp,
    # then flatten spatial and pad pw on both flat ends (width halo).
    xb = jnp.pad(x_nchw.astype(jnp.bfloat16),
                 ((0, 0), (0, Cin_pad - Cin), (ph, ph), (0, Wp - W)))
    xf = jnp.pad(xb.reshape(N, Cin_pad, (H + 2 * ph) * Wp),
                 ((0, 0), (0, 0), (pw, pw)))
    if n_tiles == 1:
        # whole image per step: the padded flat array IS the window -> no copy
        x_tiles = xf.reshape(N, 1, Cin_pad, WINL)
    else:
        # large-image fallback: overlapping per-row-tile windows (see TODO above)
        x_tiles = jnp.stack([xf[:, :, j * TW: j * TW + WINL]
                             for j in range(n_tiles)], axis=1)

    # Fold BN(eval) scale into the conv weights; shift keeps bias/mean/beta.
    scale = gamma / jnp.sqrt(running_var + eps)
    shift2d = (beta + scale * (conv_bias - running_mean)).astype(
        jnp.float32).reshape(Cout, 1)
    w_scaled = w_oihw * scale[:, None, None, None]
    w_p = jnp.pad(w_scaled, ((0, 0), (0, Cin_pad - Cin), (0, 0), (0, 0)))
    # column order must match the kernel's (kw, kh, cin) stacking order
    w_mat = jnp.transpose(w_p, (0, 3, 2, 1)).reshape(
        Cout, KW * KH * Cin_pad).astype(jnp.bfloat16)

    # per-kw width-halo validity masks (0/1 exact in bf16)
    cols = jnp.arange(TW) % Wp
    masks = jnp.stack([((cols + kw - pw >= 0) & (cols + kw - pw < W))
                       for kw in range(KW)]).astype(jnp.bfloat16)    # (KW, TW)

    kernel = functools.partial(_conv_bn_lrelu_kernel, KH=KH, KW=KW, Wp=Wp,
                               Cin_pad=Cin_pad, slope=negative_slope)

    flops = 2 * N * Cout * H * W * Cin * KH * KW
    bytes_accessed = (x_tiles.size * 2 + w_mat.size * 2 + masks.size * 2
                      + shift2d.size * 4 + N * Cout * n_tiles * TW * out_bytes)

    out_flat = pl.pallas_call(
        kernel,
        out_shape=jax.ShapeDtypeStruct((N, Cout, n_tiles * TW), out_dtype),
        grid_spec=pltpu.PrefetchScalarGridSpec(
            num_scalar_prefetch=0,
            grid=(N, n_tiles),
            in_specs=[
                pl.BlockSpec((1, 1, Cin_pad, WINL), lambda n, j: (n, j, 0, 0)),
                pl.BlockSpec((Cout, KW * KH * Cin_pad), lambda n, j: (0, 0)),
                pl.BlockSpec((KW, TW), lambda n, j: (0, 0)),
                pl.BlockSpec((Cout, 1), lambda n, j: (0, 0)),
            ],
            out_specs=pl.BlockSpec((1, Cout, TW), lambda n, j: (n, 0, j)),
            scratch_shapes=[pltpu.VMEM((KH * KW * Cin_pad, TW), jnp.bfloat16)],
        ),
        compiler_params=pltpu.CompilerParams(
            dimension_semantics=("parallel", "parallel"),
            vmem_limit_bytes=32 * 1024 * 1024),
        cost_estimate=pl.CostEstimate(flops=flops, transcendentals=0,
                                      bytes_accessed=bytes_accessed),
    )(x_tiles, w_mat, masks, shift2d)

    out = out_flat.reshape(N, Cout, H, Wp)
    return out[:, :, :, :W] if Wp > W else out


def _reference(x, w, b, gamma, beta, mean, var, eps=1e-5, slope=0.01):
    # Matches the kernel arithmetic: BN scale folded into bf16 weights, bf16
    # activations, f32 accumulation.  The kernel's final bf16 output store is
    # absorbed by the comparison tolerance.
    scale = gamma / jnp.sqrt(var + eps)
    shift = beta + scale * (b - mean)
    wq = (w * scale[:, None, None, None]).astype(jnp.bfloat16).astype(jnp.float32)
    xq = x.astype(jnp.bfloat16).astype(jnp.float32)
    y = jax.lax.conv_general_dilated(
        xq, wq, window_strides=(1, 1), padding="SAME",
        dimension_numbers=("NCHW", "OIHW", "NCHW"))
    y = y + shift[None, :, None, None]
    return jnp.where(y >= 0, y, slope * y)


if __name__ == "__main__":
    # Small deterministic setup:
    #   input_channels=4, output_channels=8, kernel_size=(3,3),
    #   dropout_op=None (Identity), norm_op=BatchNorm2d(eval), nonlin=LeakyReLU(0.01)
    key = jax.random.PRNGKey(0)
    k1, k2, k3, k4, k5, k6, k7 = jax.random.split(key, 7)

    N, Cin, H, W = 2, 4, 16, 16
    Cout, KH, KW = 8, 3, 3

    x = jax.random.normal(k1, (N, Cin, H, W), jnp.float32)
    w = jax.random.normal(k2, (Cout, Cin, KH, KW), jnp.float32) * 0.1
    conv_bias = jax.random.normal(k3, (Cout,), jnp.float32) * 0.1
    gamma = jax.random.uniform(k4, (Cout,), jnp.float32, 0.5, 1.5)
    beta = jax.random.normal(k5, (Cout,), jnp.float32) * 0.1
    running_mean = jax.random.normal(k6, (Cout,), jnp.float32) * 0.1
    running_var = jax.random.uniform(k7, (Cout,), jnp.float32, 0.5, 1.5)

    run = jax.jit(conv_dropout_norm_relu)
    out = jax.block_until_ready(
        run(x, w, conv_bias, gamma, beta, running_mean, running_var))
    assert out.shape == (N, Cout, H, W)

    ref = _reference(x, w, conv_bias, gamma, beta, running_mean, running_var)
    out_f32 = out.astype(jnp.float32)
    assert jnp.allclose(out_f32, ref, atol=1e-2, rtol=1e-2), \
        float(jnp.max(jnp.abs(out_f32 - ref)))

    print("KERNEL_OK")
</pallas_src>

<mosaic_0001>
module attributes {stable_mosaic.version = 11 : i64} {
  func.func @_conv_bn_lrelu_kernel(%arg0: i32, %arg1: i32, %arg2: memref<1x1x8x290xbf16, #tpu.memory_space<vmem>>, %arg3: memref<8x72xbf16, #tpu.memory_space<vmem>>, %arg4: memref<3x256xbf16, #tpu.memory_space<vmem>>, %arg5: memref<8x1xf32, #tpu.memory_space<vmem>>, %arg6: memref<1x8x256xbf16, #tpu.memory_space<vmem>>, %arg7: memref<72x256xbf16, #tpu.memory_space<vmem>>) attributes {dimension_semantics = [#tpu.dimension_semantics<parallel>, #tpu.dimension_semantics<parallel>], iteration_bounds = array<i64: 2, 1>, scalar_prefetch = 0 : i64, scratch_operands = 1 : i64, tpu.core_type = #tpu.core_type<tc>, window_params = [{transform_indices = @transform_0, window_bounds = array<i64: 1, 1, 8, 290>}, {pipeline_mode = #tpu.pipeline_mode<synchronous>, transform_indices = @transform_1, window_bounds = array<i64: 8, 72>}, {pipeline_mode = #tpu.pipeline_mode<synchronous>, transform_indices = @transform_2, window_bounds = array<i64: 3, 256>}, {pipeline_mode = #tpu.pipeline_mode<synchronous>, transform_indices = @transform_3, window_bounds = array<i64: 8, 1>}, {transform_indices = @transform_4, window_bounds = array<i64: 1, 8, 256>}]} {
    %c0 = arith.constant 0 : index
    %c0_0 = arith.constant 0 : index
    %c0_1 = arith.constant 0 : index
    %c0_2 = arith.constant 0 : index
    %0 = vector.load %arg2[%c0, %c0_0, %c0_1, %c0_2] : memref<1x1x8x290xbf16, #tpu.memory_space<vmem>>, vector<1x1x8x290xbf16>
    %1 = vector.shape_cast %0 : vector<1x1x8x290xbf16> to vector<8x290xbf16>
    %c0_3 = arith.constant 0 : index
    %c0_4 = arith.constant 0 : index
    %2 = vector.load %arg4[%c0_3, %c0_4] : memref<3x256xbf16, #tpu.memory_space<vmem>>, vector<3x256xbf16>
    %3 = vector.extract_strided_slice %2 {offsets = [0, 0], sizes = [1, 256], strides = [1, 1]} : vector<3x256xbf16> to vector<1x256xbf16>
    %4 = vector.extract_strided_slice %1 {offsets = [0, 0], sizes = [8, 256], strides = [1, 1]} : vector<8x290xbf16> to vector<8x256xbf16>
    %5 = vector.broadcast %3 : vector<1x256xbf16> to vector<8x256xbf16>
    %6 = arith.mulf %4, %5 : vector<8x256xbf16>
    %c0_5 = arith.constant 0 : index
    %c0_6 = arith.constant 0 : index
    %7 = vector.load %arg7[%c0_5, %c0_6] : memref<72x256xbf16, #tpu.memory_space<vmem>>, vector<8x256xbf16>
    tpu.vector_store %arg7[%c0_5, %c0_6], %6 {strides = array<i32>} : memref<72x256xbf16, #tpu.memory_space<vmem>>, vector<8x256xbf16>,
    %8 = vector.extract_strided_slice %1 {offsets = [0, 16], sizes = [8, 256], strides = [1, 1]} : vector<8x290xbf16> to vector<8x256xbf16>
    %9 = vector.broadcast %3 : vector<1x256xbf16> to vector<8x256xbf16>
    %10 = arith.mulf %8, %9 : vector<8x256xbf16>
    %c8 = arith.constant 8 : index
    %c0_7 = arith.constant 0 : index
    %11 = vector.load %arg7[%c8, %c0_7] : memref<72x256xbf16, #tpu.memory_space<vmem>>, vector<8x256xbf16>
    tpu.vector_store %arg7[%c8, %c0_7], %10 {strides = array<i32>} : memref<72x256xbf16, #tpu.memory_space<vmem>>, vector<8x256xbf16>,
    %12 = vector.extract_strided_slice %1 {offsets = [0, 32], sizes = [8, 256], strides = [1, 1]} : vector<8x290xbf16> to vector<8x256xbf16>
    %13 = vector.broadcast %3 : vector<1x256xbf16> to vector<8x256xbf16>
    %14 = arith.mulf %12, %13 : vector<8x256xbf16>
    %c16 = arith.constant 16 : index
    %c0_8 = arith.constant 0 : index
    %15 = vector.load %arg7[%c16, %c0_8] : memref<72x256xbf16, #tpu.memory_space<vmem>>, vector<8x256xbf16>
    tpu.vector_store %arg7[%c16, %c0_8], %14 {strides = array<i32>} : memref<72x256xbf16, #tpu.memory_space<vmem>>, vector<8x256xbf16>,
    %16 = vector.extract_strided_slice %2 {offsets = [1, 0], sizes = [1, 256], strides = [1, 1]} : vector<3x256xbf16> to vector<1x256xbf16>
    %17 = vector.extract_strided_slice %1 {offsets = [0, 1], sizes = [8, 256], strides = [1, 1]} : vector<8x290xbf16> to vector<8x256xbf16>
    %18 = vector.broadcast %16 : vector<1x256xbf16> to vector<8x256xbf16>
    %19 = arith.mulf %17, %18 : vector<8x256xbf16>
    %c24 = arith.constant 24 : index
    %c0_9 = arith.constant 0 : index
    %20 = vector.load %arg7[%c24, %c0_9] : memref<72x256xbf16, #tpu.memory_space<vmem>>, vector<8x256xbf16>
    tpu.vector_store %arg7[%c24, %c0_9], %19 {strides = array<i32>} : memref<72x256xbf16, #tpu.memory_space<vmem>>, vector<8x256xbf16>,
    %21 = vector.extract_strided_slice %1 {offsets = [0, 17], sizes = [8, 256], strides = [1, 1]} : vector<8x290xbf16> to vector<8x256xbf16>
    %22 = vector.broadcast %16 : vector<1x256xbf16> to vector<8x256xbf16>
    %23 = arith.mulf %21, %22 : vector<8x256xbf16>
    %c32 = arith.constant 32 : index
    %c0_10 = arith.constant 0 : index
    %24 = vector.load %arg7[%c32, %c0_10] : memref<72x256xbf16, #tpu.memory_space<vmem>>, vector<8x256xbf16>
    tpu.vector_store %arg7[%c32, %c0_10], %23 {strides = array<i32>} : memref<72x256xbf16, #tpu.memory_space<vmem>>, vector<8x256xbf16>,
    %25 = vector.extract_strided_slice %1 {offsets = [0, 33], sizes = [8, 256], strides = [1, 1]} : vector<8x290xbf16> to vector<8x256xbf16>
    %26 = vector.broadcast %16 : vector<1x256xbf16> to vector<8x256xbf16>
    %27 = arith.mulf %25, %26 : vector<8x256xbf16>
    %c40 = arith.constant 40 : index
    %c0_11 = arith.constant 0 : index
    %28 = vector.load %arg7[%c40, %c0_11] : memref<72x256xbf16, #tpu.memory_space<vmem>>, vector<8x256xbf16>
    tpu.vector_store %arg7[%c40, %c0_11], %27 {strides = array<i32>} : memref<72x256xbf16, #tpu.memory_space<vmem>>, vector<8x256xbf16>,
    %29 = vector.extract_strided_slice %2 {offsets = [2, 0], sizes = [1, 256], strides = [1, 1]} : vector<3x256xbf16> to vector<1x256xbf16>
    %30 = vector.extract_strided_slice %1 {offsets = [0, 2], sizes = [8, 256], strides = [1, 1]} : vector<8x290xbf16> to vector<8x256xbf16>
    %31 = vector.broadcast %29 : vector<1x256xbf16> to vector<8x256xbf16>
    %32 = arith.mulf %30, %31 : vector<8x256xbf16>
    %c48 = arith.constant 48 : index
    %c0_12 = arith.constant 0 : index
    %33 = vector.load %arg7[%c48, %c0_12] : memref<72x256xbf16, #tpu.memory_space<vmem>>, vector<8x256xbf16>
    tpu.vector_store %arg7[%c48, %c0_12], %32 {strides = array<i32>} : memref<72x256xbf16, #tpu.memory_space<vmem>>, vector<8x256xbf16>,
    %34 = vector.extract_strided_slice %1 {offsets = [0, 18], sizes = [8, 256], strides = [1, 1]} : vector<8x290xbf16> to vector<8x256xbf16>
    %35 = vector.broadcast %29 : vector<1x256xbf16> to vector<8x256xbf16>
    %36 = arith.mulf %34, %35 : vector<8x256xbf16>
    %c56 = arith.constant 56 : index
    %c0_13 = arith.constant 0 : index
    %37 = vector.load %arg7[%c56, %c0_13] : memref<72x256xbf16, #tpu.memory_space<vmem>>, vector<8x256xbf16>
    tpu.vector_store %arg7[%c56, %c0_13], %36 {strides = array<i32>} : memref<72x256xbf16, #tpu.memory_space<vmem>>, vector<8x256xbf16>,
    %38 = vector.extract_strided_slice %1 {offsets = [0, 34], sizes = [8, 256], strides = [1, 1]} : vector<8x290xbf16> to vector<8x256xbf16>
    %39 = vector.broadcast %29 : vector<1x256xbf16> to vector<8x256xbf16>
    %40 = arith.mulf %38, %39 : vector<8x256xbf16>
    %c64 = arith.constant 64 : index
    %c0_14 = arith.constant 0 : index
    %41 = vector.load %arg7[%c64, %c0_14] : memref<72x256xbf16, #tpu.memory_space<vmem>>, vector<8x256xbf16>
    tpu.vector_store %arg7[%c64, %c0_14], %40 {strides = array<i32>} : memref<72x256xbf16, #tpu.memory_space<vmem>>, vector<8x256xbf16>,
    %c0_15 = arith.constant 0 : index
    %c0_16 = arith.constant 0 : index
    %42 = vector.load %arg3[%c0_15, %c0_16] : memref<8x72xbf16, #tpu.memory_space<vmem>>, vector<8x72xbf16>
    %c0_17 = arith.constant 0 : index
    %c0_18 = arith.constant 0 : index
    %43 = vector.load %arg7[%c0_17, %c0_18] : memref<72x256xbf16, #tpu.memory_space<vmem>>, vector<72x256xbf16>
    %cst = arith.constant dense<0.000000e+00> : vector<8x256xf32>
    %44 = tpu.matmul %42, %43, %cst {dimension_numbers = #tpu.dot_dimension_numbers<[1], [0], [0], [1], [0, 0, 1, 1], [], []>} : vector<8x72xbf16>, vector<72x256xbf16>, vector<8x256xf32> -> vector<8x256xf32>
    %c0_19 = arith.constant 0 : index
    %c0_20 = arith.constant 0 : index
    %45 = vector.load %arg5[%c0_19, %c0_20] : memref<8x1xf32, #tpu.memory_space<vmem>>, vector<8x1xf32>
    %46 = vector.broadcast %45 : vector<8x1xf32> to vector<8x256xf32>
    %47 = arith.addf %44, %46 : vector<8x256xf32>
    %cst_21 = arith.constant 0.000000e+00 : f32
    %48 = vector.broadcast %cst_21 : f32 to vector<8x256xf32>
    %49 = arith.cmpf oge, %47, %48 : vector<8x256xf32>
    %cst_22 = arith.constant 0.00999999977 : f32
    %50 = vector.broadcast %cst_22 : f32 to vector<8x256xf32>
    %51 = arith.mulf %50, %47 : vector<8x256xf32>
    %52 = arith.select %49, %47, %51 : vector<8x256xi1>, vector<8x256xf32>
    %53 = arith.truncf %52 : vector<8x256xf32> to vector<8x256xbf16>
    %c0_23 = arith.constant 0 : index
    %c0_24 = arith.constant 0 : index
    %c0_25 = arith.constant 0 : index
    %54 = vector.load %arg6[%c0_23, %c0_24, %c0_25] : memref<1x8x256xbf16, #tpu.memory_space<vmem>>, vector<1x8x256xbf16>
    %55 = vector.shape_cast %54 : vector<1x8x256xbf16> to vector<8x256xbf16>
    %56 = vector.shape_cast %53 : vector<8x256xbf16> to vector<1x8x256xbf16>
    tpu.vector_store %arg6[%c0_23, %c0_24, %c0_25], %56 {strides = array<i32>} : memref<1x8x256xbf16, #tpu.memory_space<vmem>>, vector<1x8x256xbf16>,
    return
  }
  func.func @transform_0(%arg0: i32, %arg1: i32) -> (i32, i32, i32, i32) {
    %c0_i32 = arith.constant 0 : i32
    %c0_i32_0 = arith.constant 0 : i32
    %c0_i32_1 = arith.constant 0 : i32
    return %arg0, %arg1, %c0_i32, %c0_i32_0 : i32, i32, i32, i32
  }
  func.func @transform_1(%arg0: i32, %arg1: i32) -> (i32, i32) {
    %c0_i32 = arith.constant 0 : i32
    %c0_i32_0 = arith.constant 0 : i32
    %c0_i32_1 = arith.constant 0 : i32
    return %c0_i32, %c0_i32_0 : i32, i32
  }
  func.func @transform_2(%arg0: i32, %arg1: i32) -> (i32, i32) {
    %c0_i32 = arith.constant 0 : i32
    %c0_i32_0 = arith.constant 0 : i32
    %c0_i32_1 = arith.constant 0 : i32
    return %c0_i32, %c0_i32_0 : i32, i32
  }
  func.func @transform_3(%arg0: i32, %arg1: i32) -> (i32, i32) {
    %c0_i32 = arith.constant 0 : i32
    %c0_i32_0 = arith.constant 0 : i32
    %c0_i32_1 = arith.constant 0 : i32
    return %c0_i32, %c0_i32_0 : i32, i32
  }
  func.func @transform_4(%arg0: i32, %arg1: i32) -> (i32, i32, i32) {
    %c0_i32 = arith.constant 0 : i32
    %c0_i32_0 = arith.constant 0 : i32
    return %arg0, %c0_i32, %arg1 : i32, i32, i32
  }
}

</mosaic_0001>

<bundles_post_ra>
// kernel: conv_dropout_norm_relu.1
= control target key start
LH: loop header
LB: loop body
LE: loop exit
PB: predicated region body
PF: predicated region fallthrough
CT: control target
= control target key end

     0   :  { %s835_s15 = smov 0   ;;  %s837_s16 = smov 0   ;;  %s921_s0 = inlined_call_operand.vmem [shape: bf16[2,1,8,290], index: 0, kind: input, shape index: {}]   ;;  %s922_s1 = inlined_call_operand.vmem [shape: bf16[8,72], index: 1, kind: input, shape index: {}]   ;;  %s923_s2 = inlined_call_operand.vmem [shape: bf16[3,256], index: 2, kind: input, shape index: {}]   ;;  %s924_s3 = inlined_call_operand.vmem [shape: f32[8,1], index: 3, kind: input, shape index: {}]   ;;  %s925_s4 = inlined_call_operand.vmem [shape: bf16[2,8,256], index: 4, kind: output, shape index: {}]  }
   0x1   :  { %s839_s17 = smov 0  }
   0x2 LB: > { %s26_s18 = sadd.s32 1, %s787_s16  ;;  %p701_p0 = scmp.ge.s32.totalorder %s791_s17, 1  ;;  %s791_s17 = sphi %s839_s17, %s14_s17   ;;  %s787_s16 = sphi %s837_s16, %s927_s16   ;;  %s783_s15 = sphi %s835_s15, %s926_s15  }
   0x3   : > { %p28_p1 = scmp.ge.s32.totalorder %s26_s18, 2  ;;  %p182_p2 = scmp.lt.s32.totalorder %s791_s17, 3 }
   0x5   : > { %s929_s18 = smov (%p28_p1, %s26_s18), 0  ;;  %p183_p3 = pnand %p701_p0, %p182_p2 }
   0x6   : > { %v705_v0 = vld.sshfl [vmem:[%s923_s2] sm:$0x33 pattern:$0x76325410] (!%p183_p3)  ;;  %v251_v1 = vlaneseq (!%p183_p3)  ;;  %s793_s21 = smov (!%p183_p3), 16   ;;  %s794_s22 = smov (!%p183_p3), 1  }
   0x7   : > { %186 = sbr.rel (%p183_p3) target bundleno = 511 (0x1ff), region = 36  ;;  %v247_v2 = vcombine.high (!%p183_p3), %v705_v0, %v705_v0  ;;  %v315_v3 = vshrl.u32 (!%p183_p3), %v705_v0, 16  ;;  %v249_v4 = vpack.i.b16 (!%p183_p3), %v705_v0, %v705_v0  ;;  %s795_s23 = smov (!%p183_p3), 32   ;;  %vm273_vm0 = vcmask (!%p183_p3), 130048   ;;  %v489_v0 = vld [vmem:[%s924_s3] sm:$0xff] (!%p183_p3) }
   0x8   : > { %v252_v5 = vshrl.u32 (!%p183_p3), %v251_v1, 7  ;;  %s796_s24 = smov (!%p183_p3), 17   ;;  %s797_s25 = smov (!%p183_p3), 33   ;;  %vm296_vm1 = vcmask (!%p183_p3), 261120   ;;  %vm416_vm2 = vcmask (!%p183_p3), 15360   ;;  %vm337_vm3 = vcmask (!%p183_p3), 7168  }
   0x9   : > { %v256_v6 = vpack.i.b16 (!%p183_p3), %v247_v2, %v247_v2  ;;  %v316_v7 = vpack.i.b16 (!%p183_p3), %v315_v3, %v315_v3  ;;  %v322_v8 = vshrl.u32 (!%p183_p3), %v247_v2, 16  ;;  %s798_s26 = smov (!%p183_p3), 2   ;;  %s799_s27 = smov (!%p183_p3), 18   ;;  %vm359_vm4 = vcmask (!%p183_p3), 138240  }
   0xa   : > { %v253_v9 = vsub.s32 (!%p183_p3), 0, %v252_v5  ;;  %v402_v15 = vsub.s32 (!%p183_p3), 1, %v252_v5  ;;  %s800_s28 = smov (!%p183_p3), 34   ;;  %p216_p4 = scmp.lt.s32.totalorder (!%p183_p3), %s783_s15, 1  ;;  %vm381_vm5 = vcmask (!%p183_p3), 269312   ;;  %vm438_vm6 = vcmask (!%p183_p3), 146432  }
   0xb   : > { %v323_v10 = vpack.i.b16 (!%p183_p3), %v322_v8, %v322_v8  ;;  %s801_s7 = smov (!%p183_p3), 112   ;;  %s802_s8 = smov (!%p183_p3), 96   ;;  %vm460_vm7 = vcmask (!%p183_p3), 277504   ;;  %v808_v62 = vmov (!%p183_p3), 0   ;;  %vm287_vm8 = vcmask (!%p183_p3), 1043456  }
   0xc   : > { %v254_v11 = vrot.slane (!%p183_p3), %v249_v4, %v253_v9  ;;  %v261_v12 = vrot.slane (!%p183_p3), %v256_v6, %v253_v9  ;;  %v321_v13 = vrot.slane (!%p183_p3), %v316_v7, %v253_v9  ;;  %v403_v18 = vrot.slane (!%p183_p3), %v249_v4, %v402_v15  ;;  %s803_s9 = smov (!%p183_p3), 126   ;;  %s804_s10 = smov (!%p183_p3), 127   ;;  %583 = vmatprep.mubr.bf16.mxu0 (!%p183_p3), %v808_v62 }
   0xd   : > { %v328_v14 = vrot.slane (!%p183_p3), %v323_v10, %v253_v9  ;;  %v407_v19 = vrot.slane (!%p183_p3), %v256_v6, %v402_v15  ;;  %s805_s11 = smov (!%p183_p3), 111   ;;  %s806_s12 = smov (!%p183_p3), 95   ;;  %768 = vset.pattern.permute.xlu0 (!%p183_p3), %v808_v62  ;;  %vm289_vm9 = vcmask (!%p183_p3), 916480   ;;  %vm311_vm10 = vcmask (!%p183_p3), 785408  }
   0xe   : > { %v858_v16 = vcombine.low %v254_v11, %v261_v12  ;;  %s931_s15 = smov (!%p216_p4, %s783_s15), 1  ;;  %s807_s13 = smov 110   ;;  %vm352_vm11 = vcmask 1039360   ;;  %vm374_vm12 = vcmask 908288   ;;  %vm396_vm13 = vcmask 777216  }
   0xf   : > { %v707_v17 = vcombine.low %v321_v13, %v328_v14  ;;  %v708_v20 = vcombine.low %v403_v18, %v407_v19  ;;  %s726_s29 = smul.u32 12, %s931_s15  ;;  %s809_s14 = smov 94   ;;  %vm431_vm14 = vcmask 1031168   ;;  %vm453_vm15 = vcmask 900096  }
  0x10   : > { %270 = vrot.lane.b32.xlu0 %v858_v16, %s793_s21 }
  0x11   : > { %334 = vrot.lane.b32.xlu1 %v707_v17, %s794_s22  ;;  %s224_s6 = scalar_lea.vmem %s921_s0, %s726_s29 }
  0x12   : > { %v870_v22 = vld [vmem:[%s224_s6 + $0x8] sm:$0xf]  ;;  %v872_v23 = vld [vmem:[%s224_s6] sm:$0xff] }
  0x13   : > { %v268_v5 = vmul.bf16 %v858_v16, %v872_v23 }
  0x14   : > { %293 = vrot.lane.b32.xlu0 %v858_v16, %s795_s23  ;;  %s724_s23 = sshll.u32 %s931_s15, 3 }
  0x15   : > { %356 = vrot.lane.b32.xlu1 %v707_v17, %s796_s24 }
  0x18   : > { %378 = vrot.lane.b32.xlu0 %v707_v17, %s797_s25 }
  0x19   : > { %413 = vrot.lane.b32.xlu1 %v708_v20, %s798_s26  ;;  %s233_s26 = scalar_lea.vmem %s925_s4, %s724_s23 }
  0x1c   : > { %435 = vrot.lane.b32.xlu0 %v708_v20, %s799_s27 }
  0x1d   : > { %457 = vrot.lane.b32.xlu1 %v708_v20, %s800_s28 }
  0x82   : > { %v271_v21 = vpop.permute.xlu0 %270 }
  0x83   : > { %v272_v24 = vrot.slane %v271_v21, 4  ;;  %v335_v25 = vpop.permute.xlu1 %334 }
  0x84   : > { %v336_v36 = vrot.slane %v335_v25, 4 }
  0x85   : > { %v274_v26 = vsel %vm273_vm0, %v272_v24, %v271_v21  ;;  %v278_v27 = vmul.bf16 %v272_v24, %v870_v22  ;;  %vm475_vm0 = vcmask 769024  }
  0x86   : > { %v277_v28 = vmul.bf16 %v274_v26, %v872_v23  ;;  %v294_v29 = vpop.permute.xlu0 %293  ;;  %v338_v42 = vsel %vm337_vm3, %v336_v36, %v335_v25  ;;  %v342_v44 = vmul.bf16 %v336_v36, %v870_v22 }
  0x87   : > { %v295_v30 = vrot.slane %v294_v29, 4  ;;  %v357_v31 = vpop.permute.xlu1 %356  ;;  %283 = vrot.lane.b32.xlu1 %v278_v27, %s801_s7  ;;  %v341_v45 = vmul.bf16 %v338_v42, %v872_v23 }
  0x88   : > { %281 = vrot.lane.b32.xlu0 %v277_v28, %s801_s7  ;;  %v358_v43 = vrot.slane %v357_v31, 4 }
  0x89   : > { %v297_v32 = vsel %vm296_vm1, %v295_v30, %v294_v29  ;;  %v301_v33 = vmul.bf16 %v295_v30, %v870_v22  ;;  %vm540_vm1 = vcmask 588800  }
  0x8a   : > { %v300_v34 = vmul.bf16 %v297_v32, %v872_v23  ;;  %v379_v41 = vpop.permute.xlu0 %378  ;;  %v360_v46 = vsel %vm359_vm4, %v358_v43, %v357_v31  ;;  %v364_v49 = vmul.bf16 %v358_v43, %v870_v22 }
  0x8b   : > { %v414_v35 = vpop.permute.xlu1 %413  ;;  %306 = vrot.lane.b32.xlu1 %v301_v33, %s802_s8  ;;  %v380_v47 = vrot.slane %v379_v41, 4  ;;  %v363_v50 = vmul.bf16 %v360_v46, %v872_v23 }
  0x8c   : > { %v415_v37 = vrot.slane %v414_v35, 4  ;;  %304 = vrot.lane.b32.xlu0 %v300_v34, %s802_s8 }
  0x8d   : > { %v382_v51 = vsel %vm381_vm5, %v380_v47, %v379_v41  ;;  %v386_v52 = vmul.bf16 %v380_v47, %v870_v22 }
  0x8e   : > { %v417_v38 = vsel %vm416_vm2, %v415_v37, %v414_v35  ;;  %v421_v39 = vmul.bf16 %v415_v37, %v870_v22  ;;  %v436_v48 = vpop.permute.xlu0 %435  ;;  %v385_v55 = vmul.bf16 %v382_v51, %v872_v23 }
  0x8f   : > { %v420_v40 = vmul.bf16 %v417_v38, %v872_v23  ;;  %v437_v53 = vrot.slane %v436_v48, 4  ;;  %v458_v54 = vpop.permute.xlu1 %457 }
  0x90   : > { %426 = vrot.lane.b32.xlu1 %v421_v39, %s803_s9  ;;  %v459_v58 = vrot.slane %v458_v54, 4 }
  0x91   : > { %424 = vrot.lane.b32.xlu0 %v420_v40, %s803_s9  ;;  %v439_v56 = vsel %vm438_vm6, %v437_v53, %v436_v48  ;;  %v443_v57 = vmul.bf16 %v437_v53, %v870_v22 }
  0x92   : > { %v442_v59 = vmul.bf16 %v439_v56, %v872_v23  ;;  %v461_v60 = vsel %vm460_vm7, %v459_v58, %v458_v54  ;;  %v465_v61 = vmul.bf16 %v459_v58, %v870_v22 }
  0x93   : > { %v464_v63 = vmul.bf16 %v461_v60, %v872_v23 }
  0x94   : > { %347 = vrot.lane.b32.xlu1 %v342_v44, %s804_s10 }
  0x95   : > { %345 = vrot.lane.b32.xlu0 %v341_v45, %s804_s10 }
  0x98   : > { %369 = vrot.lane.b32.xlu1 %v364_v49, %s805_s11 }
  0x99   : > { %367 = vrot.lane.b32.xlu0 %v363_v50, %s805_s11 }
  0x9c   : > { %391 = vrot.lane.b32.xlu1 %v386_v52, %s806_s12 }
  0x9d   : > { %389 = vrot.lane.b32.xlu0 %v385_v55, %s806_s12 }
  0xa0   : > { %448 = vrot.lane.b32.xlu1 %v443_v57, %s807_s13 }
  0xa1   : > { %446 = vrot.lane.b32.xlu0 %v442_v59, %s807_s13 }
  0xa4   : > { %470 = vrot.lane.b32.xlu1 %v465_v61, %s809_s14  ;;  %v479_v61 = vld [vmem:[%s922_s1] sm:$0xf] }
  0xa5   : > { %468 = vrot.lane.b32.xlu0 %v464_v63, %s809_s14 }
  0xa9   : > { %492 = vperm.xlu0 %768, %v489_v0  }
  0xf9   : > { %v284_v1 = vpop.permute.xlu1 %283 }
  0xfa   : > { %v286_v2 = vrot.slane %v284_v1, 4  ;;  %v282_v3 = vpop.permute.xlu0 %281 }
  0xfb   : > { %v285_v4 = vrot.slane %v282_v3, 4 }
  0xfd   : > { %v307_v6 = vpop.permute.xlu1 %306  ;;  %v288_v7 = vsel %vm287_vm8, %v285_v4, %v286_v2 }
  0xfe   : > { %v305_v8 = vpop.permute.xlu0 %304  ;;  %v290_v9 = vsel %vm289_vm9, %v282_v3, %v288_v7  ;;  %v309_v14 = vrot.slane %v307_v6, 4 }
  0xff   : > { %v710_v10 = vcombine.high %v268_v5, %v290_v9  ;;  %v709_v11 = vcombine.low %v268_v5, %v290_v9  ;;  %v308_v15 = vrot.slane %v305_v8, 4 }
 0x101   : > { %551 = vmatprep.subr.bf16.mxu0 %v710_v10  ;;  %v310_v16 = vsel %vm287_vm8, %v308_v15, %v309_v14 }
 0x102   : > { %v427_v12 = vpop.permute.xlu1 %426  ;;  %552 = vmatpush1.bf16.msra.mxu0 %v709_v11  ;;  %v312_v23 = vsel %vm311_vm10, %v305_v8, %v310_v16 }
 0x103   : > { %v425_v13 = vpop.permute.xlu0 %424  ;;  %v429_v33 = vrot.slane %v427_v12, 4 }
 0x104   : > { %v428_v34 = vrot.slane %v425_v13, 4 }
 0x106   : > { %v348_v17 = vpop.permute.xlu1 %347  ;;  %v430_v43 = vsel %vm287_vm8, %v428_v34, %v429_v33 }
 0x107   : > { %v350_v18 = vrot.slane %v348_v17, 4  ;;  %v346_v19 = vpop.permute.xlu0 %345  ;;  %v432_v49 = vsel %vm431_vm14, %v425_v13, %v430_v43 }
 0x108   : > { %v349_v20 = vrot.slane %v346_v19, 4 }
 0x10a   : > { %v351_v21 = vsel %vm287_vm8, %v349_v20, %v350_v18  ;;  %v370_v22 = vpop.permute.xlu1 %369 }
 0x10b   : > { %v353_v24 = vsel %vm352_vm11, %v346_v19, %v351_v21  ;;  %v368_v25 = vpop.permute.xlu0 %367  ;;  %v372_v28 = vrot.slane %v370_v22, 4 }
 0x10c   : > { %v711_v26 = vcombine.low %v312_v23, %v353_v24  ;;  %v712_v27 = vcombine.high %v312_v23, %v353_v24  ;;  %v371_v29 = vrot.slane %v368_v25, 4 }
 0x10e   : > { %v392_v30 = vpop.permute.xlu1 %391  ;;  %553 = vmatprep.subr.bf16.mxu0 %v712_v27  ;;  %v373_v35 = vsel %vm287_vm8, %v371_v29, %v372_v28 }
 0x10f   : > { %v394_v31 = vrot.slane %v392_v30, 4  ;;  %v390_v32 = vpop.permute.xlu0 %389  ;;  %554 = vmatpush1.bf16.msra.mxu0 %v711_v26  ;;  %v375_v39 = vsel %vm374_vm12, %v368_v25, %v373_v35 }
 0x110   : > { %v393_v36 = vrot.slane %v390_v32, 4 }
 0x112   : > { %v395_v37 = vsel %vm287_vm8, %v393_v36, %v394_v31  ;;  %v449_v38 = vpop.permute.xlu1 %448 }
 0x113   : > { %v397_v40 = vsel %vm396_vm13, %v390_v32, %v395_v37  ;;  %v451_v41 = vrot.slane %v449_v38, 4  ;;  %v447_v42 = vpop.permute.xlu0 %446 }
 0x114   : > { %v713_v44 = vcombine.low %v375_v39, %v397_v40  ;;  %v714_v45 = vcombine.high %v375_v39, %v397_v40  ;;  %v450_v46 = vrot.slane %v447_v42, 4 }
 0x116   : > { %v452_v47 = vsel %vm287_vm8, %v450_v46, %v451_v41  ;;  %v471_v48 = vpop.permute.xlu1 %470  ;;  %555 = vmatprep.subr.bf16.mxu0 %v714_v45 }
 0x117   : > { %v454_v50 = vsel %vm453_vm15, %v447_v42, %v452_v47  ;;  %v473_v51 = vrot.slane %v471_v48, 4  ;;  %v469_v52 = vpop.permute.xlu0 %468  ;;  %556 = vmatpush1.bf16.msra.mxu0 %v713_v44 }
 0x118   : > { %v715_v53 = vcombine.low %v432_v49, %v454_v50  ;;  %v716_v54 = vcombine.high %v432_v49, %v454_v50  ;;  %v472_v55 = vrot.slane %v469_v52, 4 }
 0x11a   : > { %v474_v56 = vsel %vm287_vm8, %v472_v55, %v473_v51  ;;  %557 = vmatprep.subr.bf16.mxu0 %v716_v54 }
 0x11b   : > { %v476_v57 = vsel %vm475_vm0, %v469_v52, %v474_v56  ;;  %558 = vmatpush1.bf16.msra.mxu0 %v715_v53 }
 0x11c   : > { %v717_v58 = vcombine.low %v476_v57, %v476_v57  ;;  %v718_v59 = vcombine.high %v476_v57, %v476_v57 }
 0x11e   : > { %719 = vmatprep.subr.msk.bf16.mxu0 %vm287_vm8, %v718_v59  ;;  %v546_v60 = vsel %vm287_vm8, %v717_v58, 0 }
 0x11f   : > { %560 = vmatpush1.bf16.msra.mxu0 %v546_v60 }
 0x122   : > { %720 = vmatmul.mubr.msk.bf16.vlgmr.msra.gmra.mrb[0].mxu0 %vm540_vm1, %v479_v61 }
 0x128   : > { %v493_v62 = vpop.permute.xlu0 %492 }
 0x1f5   : > { %v585_v63 = vpop.f32.mrb[0].mxu0 }
 0x1f6   : > { %v586_v0 = vadd.f32 %v585_v63, %v493_v62  ;;  %v587_v1 = vpop.f32.mrb[1].mxu0 }
 0x1f7   : > { %v588_v2 = vadd.f32 %v587_v1, %v493_v62  ;;  %v589_v3 = vpop.f32.mrb[2].mxu0 }
 0x1f8   : > { %vm592_vm2 = vcmp.ge.f32.partialorder %v586_v0, 0.0  ;;  %v594_v4 = vmul.f32 0.01, %v586_v0  ;;  %v590_v5 = vpop.f32.mrb[3].mxu0 }
 0x1f9   : > { %vm593_vm3 = vcmp.ge.f32.partialorder %v588_v2, 0.0  ;;  %v595_v6 = vmul.f32 0.01, %v588_v2 }
 0x1fa   : > { %v596_v7 = vsel %vm592_vm2, %v586_v0, %v594_v4 }
 0x1fb   : > { %v597_v8 = vsel %vm593_vm3, %v588_v2, %v595_v6 }
 0x1fc   : > { %v725_v9 = vpack.c.bf16 %v597_v8, %v596_v7 }
 0x1fe   : > { %606 = vst [vmem:[%s233_s26] sm:$0xff] %v725_v9 }
 0x1ff PF: > { %s14_s17 = sadd.s32 1, %s791_s17   ;;  %s926_s15 = smov %s787_s16 }
 0x200   : > { %p11_p5 = scmp.ge.s32.totalorder %s14_s17, 4   ;;  %s927_s16 = smov %s929_s18 }
 0x202   :  { %13 = sbr.rel (!%p11_p5) target bundleno = 2 (0x2), region = 66 }

</bundles_post_ra>
